<compile_context>
chip_gen: v5e
topology: v5e:2x2
jax: 0.10.0
libtpu: 0.0.40
codegen_flags: <defaults>
</compile_context>

<pallas_src>
import math

import jax
import jax.numpy as jnp
from jax.experimental import pallas as pl
from jax.experimental.pallas import tpu as pltpu


# Kron(W1, W2) is kept fully resident in VMEM only below this size
# (4 MiB f32  <=>  width = height <= 32).
_KRON_VMEM_BYTES = 4 << 20
# Per-grid-step budget for the (input block + output block) pair; with double
# buffering plus resident weights peak VMEM stays ~20 MiB.
_BLOCK_BUDGET_BYTES = 6 << 20
_VMEM_LIMIT_BYTES = 32 << 20


# ---------------------------------------------------------------------------
# Kernels
# ---------------------------------------------------------------------------

def _dct2d_kron_kernel(x_ref, kt_ref, o_ref):
    """One lane-dense GEMM: out_flat = x_flat @ kron(W1, W2)^T."""
    o_ref[...] = jnp.dot(
        x_ref[...], kt_ref[...], preferred_element_type=jnp.float32
    ).astype(o_ref.dtype)


def _dct2d_fused_kernel(x_ref, w1_ref, w2t_ref, o_ref):
    """Fallback (large width/height): out[b] = W1 @ X[b] @ W2^T, fused."""
    bm, h, _ = x_ref.shape
    w = w2t_ref.shape[1]
    # Shared-RHS multiply first, batch stacked on the MXU M dimension:
    #   (bm*H, H) @ (H, W) -> (bm*H, W)   ==   X[b] @ W2^T for every b.
    v = jnp.dot(
        x_ref[...].reshape(bm * h, h), w2t_ref[...],
        preferred_element_type=jnp.float32,
    ).reshape(bm, h, w)
    # Single batched left-multiply by W1 (no per-item Python unroll).
    w1b = jnp.broadcast_to(
        w1_ref[...].astype(jnp.float32), (bm,) + w1_ref.shape)
    o_ref[...] = jax.lax.dot_general(
        w1b, v,
        dimension_numbers=(((2,), (1,)), ((0,), (0,))),
        preferred_element_type=jnp.float32,
    ).astype(o_ref.dtype)


# ---------------------------------------------------------------------------
# Block sizing
# ---------------------------------------------------------------------------

def _pick_batch_block(m, per_item_bytes, *, align,
                      budget_bytes=_BLOCK_BUDGET_BYTES, min_grid_steps=2):
    """Rows per grid step: as many as the VMEM budget allows, `align`-aligned,
    while keeping >= min_grid_steps when the batch is big enough (v7x megacore).
    The batch is padded up to a multiple of the block by the caller, so odd
    batch sizes never degrade to tiny blocks."""
    bm = max(1, budget_bytes // max(1, per_item_bytes))
    bm = min(bm, pl.cdiv(m, min_grid_steps))     # leave work for the 2nd core
    bm = max(align, (bm // align) * align)       # aligned leading block dim
    return bm


# ---------------------------------------------------------------------------
# Forward wrappers
# ---------------------------------------------------------------------------

def _forward_kron(x, w1, w2, lead, m, width, height):
    hh, ww = height * height, width * width
    # Row-major identity: vec_r(W1 X W2^T) = (W1 ⊗ W2) vec_r(X)
    #   => out_flat = x_flat @ kron(W1, W2)^T
    kt = jnp.kron(w1, w2).T.astype(jnp.float32)          # (H^2, W^2), resident
    x_flat = x.reshape(m, hh)

    per_item = (hh + ww) * x.dtype.itemsize
    bm = _pick_batch_block(m, per_item, align=8)
    steps = pl.cdiv(m, bm)
    m_pad = steps * bm
    if m_pad != m:
        x_flat = jnp.pad(x_flat, ((0, m_pad - m), (0, 0)))

    out = pl.pallas_call(
        _dct2d_kron_kernel,
        out_shape=jax.ShapeDtypeStruct((m_pad, ww), x.dtype),
        grid=(steps,),
        in_specs=[
            pl.BlockSpec((bm, hh), lambda i: (i, 0)),    # lane-dense input rows
            pl.BlockSpec((hh, ww), lambda i: (0, 0)),    # resident kron weights
        ],
        out_specs=pl.BlockSpec((bm, ww), lambda i: (i, 0)),  # lane-dense output
        compiler_params=pltpu.CompilerParams(
            dimension_semantics=("parallel",),
            vmem_limit_bytes=_VMEM_LIMIT_BYTES,
        ),
    )(x_flat, kt)
    return out[:m].reshape(*lead, width, width)


def _forward_fused(x, w1, w2, lead, m, width, height):
    x3 = x.reshape(m, height, height)
    w2t = jnp.swapaxes(w2, 0, 1)                         # (H, W), one-time

    itemsize = max(x.dtype.itemsize, 4)
    per_item = (height * height + width * width + 2 * height * width) * itemsize
    bm = _pick_batch_block(m, per_item, align=1)
    steps = pl.cdiv(m, bm)
    m_pad = steps * bm
    if m_pad != m:
        x3 = jnp.pad(x3, ((0, m_pad - m), (0, 0), (0, 0)))

    out = pl.pallas_call(
        _dct2d_fused_kernel,
        out_shape=jax.ShapeDtypeStruct((m_pad, width, width), x.dtype),
        grid=(steps,),
        in_specs=[
            pl.BlockSpec((bm, height, height), lambda i: (i, 0, 0)),
            pl.BlockSpec((width, height), lambda i: (0, 0)),   # resident W1
            pl.BlockSpec((height, width), lambda i: (0, 0)),   # resident W2^T
        ],
        out_specs=pl.BlockSpec((bm, width, width), lambda i: (i, 0, 0)),
        compiler_params=pltpu.CompilerParams(
            dimension_semantics=("parallel",),
            vmem_limit_bytes=_VMEM_LIMIT_BYTES,
        ),
    )(x3, w1, w2t)
    return out[:m].reshape(*lead, width, width)


def dct_ii_2d_comparison(x, w1, w2):
    """out = W1 @ x @ W2^T over the last two dims (batched).

    x  : (..., height, height)
    w1 : (width, height)   (weights_1)
    w2 : (width, height)   (weights_2)
    returns (..., width, width)
    """
    width, height = w1.shape
    assert w2.shape == (width, height), (w2.shape, w1.shape)
    assert x.shape[-2:] == (height, height), x.shape

    lead = x.shape[:-2]
    m = int(math.prod(lead))                              # math.prod(()) == 1

    kron_bytes = (width * width) * (height * height) * 4
    if kron_bytes <= _KRON_VMEM_BYTES:
        return _forward_kron(x, w1, w2, lead, m, width, height)
    return _forward_fused(x, w1, w2, lead, m, width, height)


if __name__ == "__main__":
    width = height = 16
    key = jax.random.PRNGKey(0)
    k1, k2, kx = jax.random.split(key, 3)

    # Same init distribution as the PyTorch module: uniform(+-1/sqrt(height)).
    stdv = 1.0 / math.sqrt(height)
    w1 = jax.random.uniform(k1, (width, height), jnp.float32, -stdv, stdv)
    w2 = jax.random.uniform(k2, (width, height), jnp.float32, -stdv, stdv)
    x = jax.random.normal(kx, (2, 4, height, height), dtype=jnp.float32)

    fwd = jax.jit(dct_ii_2d_comparison)
    out = jax.block_until_ready(fwd(x, w1, w2))
    assert out.shape == (2, 4, width, width) and out.dtype == jnp.float32, (
        out.shape, out.dtype)

    # Reference: the literal PyTorch forward
    #   F.linear(x^T, W1) -> transpose -> F.linear(., W2)
    xt = jnp.swapaxes(x, -2, -1)
    mid = jnp.matmul(xt, jnp.swapaxes(w1, 0, 1))
    ref = jnp.matmul(jnp.swapaxes(mid, -2, -1), jnp.swapaxes(w2, 0, 1))
    err = float(jnp.max(jnp.abs(out - ref)))
    assert err < 1e-4, f"max abs err vs reference: {err}"

    print("KERNEL_OK")
</pallas_src>

<mosaic_0001>
module attributes {stable_mosaic.version = 11 : i64} {
  func.func @_dct2d_kron_kernel(%arg0: i32, %arg1: memref<8x256xf32, #tpu.memory_space<vmem>>, %arg2: memref<256x256xf32, #tpu.memory_space<vmem>>, %arg3: memref<8x256xf32, #tpu.memory_space<vmem>>) attributes {dimension_semantics = [#tpu.dimension_semantics<parallel>], iteration_bounds = array<i64: 1>, scalar_prefetch = 0 : i64, scratch_operands = 0 : i64, tpu.core_type = #tpu.core_type<tc>, window_params = [{transform_indices = @transform_0, window_bounds = array<i64: 8, 256>}, {pipeline_mode = #tpu.pipeline_mode<synchronous>, transform_indices = @transform_1, window_bounds = array<i64: 256, 256>}, {transform_indices = @transform_2, window_bounds = array<i64: 8, 256>}]} {
    %c0 = arith.constant 0 : index
    %c0_0 = arith.constant 0 : index
    %0 = vector.load %arg1[%c0, %c0_0] : memref<8x256xf32, #tpu.memory_space<vmem>>, vector<8x256xf32>
    %c0_1 = arith.constant 0 : index
    %c0_2 = arith.constant 0 : index
    %1 = vector.load %arg2[%c0_1, %c0_2] : memref<256x256xf32, #tpu.memory_space<vmem>>, vector<256x256xf32>
    %cst = arith.constant dense<0.000000e+00> : vector<8x256xf32>
    %2 = tpu.matmul %0, %1, %cst {dimension_numbers = #tpu.dot_dimension_numbers<[1], [0], [0], [1], [0, 0, 1, 1], [], []>} : vector<8x256xf32>, vector<256x256xf32>, vector<8x256xf32> -> vector<8x256xf32>
    %c0_3 = arith.constant 0 : index
    %c0_4 = arith.constant 0 : index
    %3 = vector.load %arg3[%c0_3, %c0_4] : memref<8x256xf32, #tpu.memory_space<vmem>>, vector<8x256xf32>
    tpu.vector_store %arg3[%c0_3, %c0_4], %2 {strides = array<i32>} : memref<8x256xf32, #tpu.memory_space<vmem>>, vector<8x256xf32>,
    return
  }
  func.func @transform_0(%arg0: i32) -> (i32, i32) {
    %c0_i32 = arith.constant 0 : i32
    %c0_i32_0 = arith.constant 0 : i32
    return %arg0, %c0_i32 : i32, i32
  }
  func.func @transform_1(%arg0: i32) -> (i32, i32) {
    %c0_i32 = arith.constant 0 : i32
    %c0_i32_0 = arith.constant 0 : i32
    %c0_i32_1 = arith.constant 0 : i32
    return %c0_i32, %c0_i32_0 : i32, i32
  }
  func.func @transform_2(%arg0: i32) -> (i32, i32) {
    %c0_i32 = arith.constant 0 : i32
    %c0_i32_0 = arith.constant 0 : i32
    return %arg0, %c0_i32 : i32, i32
  }
}

</mosaic_0001>

<bundles_post_ra>
// kernel: dct_ii_2d_comparison.1
= control target key start
LH: loop header
LB: loop body
LE: loop exit
PB: predicated region body
PF: predicated region fallthrough
CT: control target
= control target key end

     0   :  { %s382_s1 = inlined_call_operand.vmem [shape: f32[256,256], index: 1, kind: input, shape index: {}]   ;;  %s383_s0 = inlined_call_operand.vmem [shape: f32[8,256], index: 0, kind: input, shape index: {}]   ;;  %s384_s2 = inlined_call_operand.vmem [shape: f32[8,256], index: 2, kind: output, shape index: {}]  }
   0x1   :  { %v44_v0 = vld [vmem:[%s382_s1 + $0xf8] sm:$0xff]  ;;  %v42_v2 = vld [vmem:[%s382_s1 + $0xe8] sm:$0xff]  ;;  %v43_v6 = vld [vmem:[%s382_s1 + $0xf0] sm:$0xff] }
   0x2   :  { %v76_v1 = vld [vmem:[%s382_s1 + $0x1f8] sm:$0xff]  ;;  %117 = vmatpush.msra.mxu2 %v44_v0  ;;  %v74_v3 = vld [vmem:[%s382_s1 + $0x1e8] sm:$0xff]  ;;  %v75_v7 = vld [vmem:[%s382_s1 + $0x1f0] sm:$0xff]  ;;  %77 = vmatpush.msra.mxu0 %v43_v6 }
   0x3   :  { %137 = vmatpush.msra.mxu3 %v76_v1  ;;  %v40_v4 = vld [vmem:[%s382_s1 + $0xd8] sm:$0xff]  ;;  %v41_v8 = vld [vmem:[%s382_s1 + $0xe0] sm:$0xff]  ;;  %97 = vmatpush.msra.mxu1 %v75_v7  ;;  %v38_v10 = vld [vmem:[%s382_s1 + $0xc8] sm:$0xff] }
   0x4   :  { %v72_v5 = vld [vmem:[%s382_s1 + $0x1d8] sm:$0xff]  ;;  %118 = vmatpush.msra.mxu2 %v42_v2  ;;  %v73_v9 = vld [vmem:[%s382_s1 + $0x1e0] sm:$0xff]  ;;  %v70_v11 = vld [vmem:[%s382_s1 + $0x1c8] sm:$0xff]  ;;  %78 = vmatpush.msra.mxu0 %v41_v8 }
   0x5   :  { %138 = vmatpush.msra.mxu3 %v74_v3  ;;  %v39_v12 = vld [vmem:[%s382_s1 + $0xd0] sm:$0xff]  ;;  %98 = vmatpush.msra.mxu1 %v73_v9  ;;  %v36_v14 = vld [vmem:[%s382_s1 + $0xb8] sm:$0xff]  ;;  %v37_v16 = vld [vmem:[%s382_s1 + $0xc0] sm:$0xff] }
   0x6   :  { %119 = vmatpush.msra.mxu2 %v40_v4  ;;  %v71_v13 = vld [vmem:[%s382_s1 + $0x1d0] sm:$0xff]  ;;  %v68_v15 = vld [vmem:[%s382_s1 + $0x1b8] sm:$0xff]  ;;  %v69_v17 = vld [vmem:[%s382_s1 + $0x1c0] sm:$0xff]  ;;  %79 = vmatpush.msra.mxu0 %v39_v12 }
   0x7   :  { %139 = vmatpush.msra.mxu3 %v72_v5  ;;  %99 = vmatpush.msra.mxu1 %v71_v13  ;;  %v34_v18 = vld [vmem:[%s382_s1 + $0xa8] sm:$0xff]  ;;  %v35_v20 = vld [vmem:[%s382_s1 + $0xb0] sm:$0xff]  ;;  %v32_v22 = vld [vmem:[%s382_s1 + $0x98] sm:$0xff] }
   0x8   :  { %120 = vmatpush.msra.mxu2 %v38_v10  ;;  %v66_v19 = vld [vmem:[%s382_s1 + $0x1a8] sm:$0xff]  ;;  %v67_v21 = vld [vmem:[%s382_s1 + $0x1b0] sm:$0xff]  ;;  %80 = vmatpush.msra.mxu0 %v37_v16  ;;  %v64_v23 = vld [vmem:[%s382_s1 + $0x198] sm:$0xff] }
   0x9   :  { %140 = vmatpush.msra.mxu3 %v70_v11  ;;  %100 = vmatpush.msra.mxu1 %v69_v17  ;;  %v33_v24 = vld [vmem:[%s382_s1 + $0xa0] sm:$0xff]  ;;  %v30_v26 = vld [vmem:[%s382_s1 + $0x88] sm:$0xff]  ;;  %v31_v28 = vld [vmem:[%s382_s1 + $0x90] sm:$0xff] }
   0xa   :  { %121 = vmatpush.msra.mxu2 %v36_v14  ;;  %v65_v25 = vld [vmem:[%s382_s1 + $0x1a0] sm:$0xff]  ;;  %81 = vmatpush.msra.mxu0 %v35_v20  ;;  %v62_v27 = vld [vmem:[%s382_s1 + $0x188] sm:$0xff]  ;;  %v63_v29 = vld [vmem:[%s382_s1 + $0x190] sm:$0xff] }
   0xb   :  { %141 = vmatpush.msra.mxu3 %v68_v15  ;;  %101 = vmatpush.msra.mxu1 %v67_v21  ;;  %v28_v30 = vld [vmem:[%s382_s1 + $0x78] sm:$0xff]  ;;  %v29_v32 = vld [vmem:[%s382_s1 + $0x80] sm:$0xff]  ;;  %v26_v34 = vld [vmem:[%s382_s1 + $0x68] sm:$0xff] }
   0xc   :  { %122 = vmatpush.msra.mxu2 %v34_v18  ;;  %82 = vmatpush.msra.mxu0 %v33_v24  ;;  %v60_v31 = vld [vmem:[%s382_s1 + $0x178] sm:$0xff]  ;;  %v61_v33 = vld [vmem:[%s382_s1 + $0x180] sm:$0xff]  ;;  %v58_v35 = vld [vmem:[%s382_s1 + $0x168] sm:$0xff] }
   0xd   :  { %142 = vmatpush.msra.mxu3 %v66_v19  ;;  %102 = vmatpush.msra.mxu1 %v65_v25  ;;  %v27_v36 = vld [vmem:[%s382_s1 + $0x70] sm:$0xff]  ;;  %v24_v38 = vld [vmem:[%s382_s1 + $0x58] sm:$0xff]  ;;  %v25_v40 = vld [vmem:[%s382_s1 + $0x60] sm:$0xff] }
   0xe   :  { %123 = vmatpush.msra.mxu2 %v32_v22  ;;  %83 = vmatpush.msra.mxu0 %v31_v28  ;;  %v59_v37 = vld [vmem:[%s382_s1 + $0x170] sm:$0xff]  ;;  %v56_v39 = vld [vmem:[%s382_s1 + $0x158] sm:$0xff]  ;;  %v57_v41 = vld [vmem:[%s382_s1 + $0x160] sm:$0xff] }
   0xf   :  { %143 = vmatpush.msra.mxu3 %v64_v23  ;;  %103 = vmatpush.msra.mxu1 %v63_v29  ;;  %v22_v42 = vld [vmem:[%s382_s1 + $0x48] sm:$0xff]  ;;  %v23_v44 = vld [vmem:[%s382_s1 + $0x50] sm:$0xff]  ;;  %v20_v46 = vld [vmem:[%s382_s1 + $0x38] sm:$0xff] }
  0x10   :  { %124 = vmatpush.msra.mxu2 %v30_v26  ;;  %84 = vmatpush.msra.mxu0 %v29_v32  ;;  %v54_v43 = vld [vmem:[%s382_s1 + $0x148] sm:$0xff]  ;;  %v55_v45 = vld [vmem:[%s382_s1 + $0x150] sm:$0xff]  ;;  %v52_v47 = vld [vmem:[%s382_s1 + $0x138] sm:$0xff] }
  0x11   :  { %144 = vmatpush.msra.mxu3 %v62_v27  ;;  %104 = vmatpush.msra.mxu1 %v61_v33  ;;  %v21_v48 = vld [vmem:[%s382_s1 + $0x40] sm:$0xff]  ;;  %v18_v50 = vld [vmem:[%s382_s1 + $0x28] sm:$0xff]  ;;  %v19_v52 = vld [vmem:[%s382_s1 + $0x30] sm:$0xff] }
  0x12   :  { %125 = vmatpush.msra.mxu2 %v28_v30  ;;  %85 = vmatpush.msra.mxu0 %v27_v36  ;;  %v53_v49 = vld [vmem:[%s382_s1 + $0x140] sm:$0xff]  ;;  %v50_v51 = vld [vmem:[%s382_s1 + $0x128] sm:$0xff]  ;;  %v51_v53 = vld [vmem:[%s382_s1 + $0x130] sm:$0xff] }
  0x13   :  { %145 = vmatpush.msra.mxu3 %v60_v31  ;;  %105 = vmatpush.msra.mxu1 %v59_v37  ;;  %v16_v54 = vld [vmem:[%s382_s1 + $0x18] sm:$0xff]  ;;  %v17_v56 = vld [vmem:[%s382_s1 + $0x20] sm:$0xff]  ;;  %v14_v58 = vld [vmem:[%s382_s1 + $0x8] sm:$0xff] }
  0x14   :  { %126 = vmatpush.msra.mxu2 %v26_v34  ;;  %86 = vmatpush.msra.mxu0 %v25_v40  ;;  %v48_v55 = vld [vmem:[%s382_s1 + $0x118] sm:$0xff]  ;;  %v49_v57 = vld [vmem:[%s382_s1 + $0x120] sm:$0xff]  ;;  %v46_v59 = vld [vmem:[%s382_s1 + $0x108] sm:$0xff] }
  0x15   :  { %146 = vmatpush.msra.mxu3 %v58_v35  ;;  %106 = vmatpush.msra.mxu1 %v57_v41  ;;  %v11_v60 = vld [vmem:[%s383_s0] sm:$0xff]  ;;  %v12_v61 = vld [vmem:[%s383_s0 + $0x8] sm:$0xff]  ;;  %v15_v62 = vld [vmem:[%s382_s1 + $0x10] sm:$0xff] }
  0x16   :  { %127 = vmatpush.msra.mxu2 %v24_v38  ;;  %87 = vmatpush.msra.mxu0 %v23_v44  ;;  %v47_v63 = vld [vmem:[%s382_s1 + $0x110] sm:$0xff]  ;;  %v13_v0 = vld [vmem:[%s382_s1] sm:$0xff] }
  0x17   :  { %147 = vmatpush.msra.mxu3 %v56_v39  ;;  %107 = vmatpush.msra.mxu1 %v55_v45  ;;  %v45_v1 = vld [vmem:[%s382_s1 + $0x100] sm:$0xff] }
  0x18   :  { %128 = vmatpush.msra.mxu2 %v22_v42  ;;  %88 = vmatpush.msra.mxu0 %v21_v48 }
  0x19   :  { %148 = vmatpush.msra.mxu3 %v54_v43  ;;  %108 = vmatpush.msra.mxu1 %v53_v49 }
  0x1a   :  { %129 = vmatpush.msra.mxu2 %v20_v46  ;;  %89 = vmatpush.msra.mxu0 %v19_v52 }
  0x1b   :  { %149 = vmatpush.msra.mxu3 %v52_v47  ;;  %109 = vmatpush.msra.mxu1 %v51_v53 }
  0x1c   :  { %130 = vmatpush.msra.mxu2 %v18_v50  ;;  %90 = vmatpush.msra.mxu0 %v17_v56 }
  0x1d   :  { %150 = vmatpush.msra.mxu3 %v50_v51  ;;  %110 = vmatpush.msra.mxu1 %v49_v57 }
  0x1e   :  { %131 = vmatpush.msra.mxu2 %v16_v54  ;;  %91 = vmatpush.msra.mxu0 %v15_v62 }
  0x1f   :  { %151 = vmatpush.msra.mxu3 %v48_v55  ;;  %111 = vmatpush.msra.mxu1 %v47_v63 }
  0x20   :  { %132 = vmatpush.msra.mxu2 %v14_v58  ;;  %92 = vmatpush.msra.mxu0 %v13_v0 }
  0x21   :  { %152 = vmatpush.msra.mxu3 %v46_v59  ;;  %133 = vmatmul.f32.vlgmr.msra.gmra.mxu2 %v11_v60 }
  0x22   :  { %153 = vmatmul.f32.vlgmr.msra.gmra.mxu3 %v12_v61  ;;  %112 = vmatpush.msra.mxu1 %v45_v1 }
  0x23   :  { %93 = vmatmul.f32.vlgmr.msra.gmra.mxu0 %v11_v60  ;;  %113 = vmatmul.f32.vlgmr.msra.gmra.mxu1 %v12_v61 }
  0xa0   :  { %v94_v2 = vpop.f32.mrf.mxu0  ;;  %v114_v3 = vpop.f32.mrf.mxu1 }
  0xa1   :  { %v115_v4 = vadd.f32 %v114_v3, %v94_v2 }
  0xa3   :  { %157 = vst [vmem:[%s384_s2] sm:$0xff] %v115_v4 }
  0xa4   :  { %v134_v5 = vpop.f32.mrf.mxu2 }
  0xa5   :  { %v154_v6 = vpop.f32.mrf.mxu3 }
  0xa6   :  { %v155_v7 = vadd.f32 %v154_v6, %v134_v5 }
  0xa8   :  { %158 = vst [vmem:[%s384_s2 + $0x8] sm:$0xff] %v155_v7 }

</bundles_post_ra>
